<compile_context>
chip_gen: v7x
topology: tpu7x:2x2x1
jax: 0.10.0
libtpu: 0.0.40
codegen_flags: <defaults>
</compile_context>

<pallas_src>
import jax
import jax.numpy as jnp
from jax.experimental import pallas as pl
from jax.experimental.pallas import tpu as pltpu

_BN_EPS = 1e-5
_VMEM_LIMIT = 48 * 1024 * 1024   # below v7x's 64 MiB physical VMEM, plenty here
_LANE = 128
_SUBLANE = 8


def _round_up(v, m):
    return -(-v // m) * m


# ---------------------------------------------------------------------------
# kernels
# ---------------------------------------------------------------------------
def _make_conv_bn_kernel(*, K, TL, pad, L, n_tiles, inv_count,
                         apply_in_affine, mask_tail):
    """One (n, j) grid step: in-VMEM im2col over a halo window, one MXU matmul,
    BN batch-statistic accumulation (masked against length padding).

    If `apply_in_affine`, a per-channel (scale, shift) affine + relu is applied
    once per halo element before the K replication (fused BN_1 + relu feeding
    conv_2).  At the last grid step the (scale, shift) of this conv's own
    BatchNorm is emitted.
    """

    def kernel(*refs):
        if pad > 0:
            if apply_in_affine:
                (apL, apR, a_ref, w_ref, b_ref, gb_ref,
                 z_ref, sc_ref, s_acc, q_acc) = refs
            else:
                (apL, apR, w_ref, b_ref, gb_ref,
                 z_ref, sc_ref, s_acc, q_acc) = refs
        else:
            if apply_in_affine:
                (apL, a_ref, w_ref, b_ref, gb_ref,
                 z_ref, sc_ref, s_acc, q_acc) = refs
            else:
                (apL, w_ref, b_ref, gb_ref,
                 z_ref, sc_ref, s_acc, q_acc) = refs

        n = pl.program_id(0)
        j = pl.program_id(1)
        step = n * n_tiles + j

        # halo window (C, TL + 2*pad) from two adjacent lane tiles (VMEM only)
        if pad > 0:
            right = apR[0]
            win = jnp.concatenate([apL[0], right[:, 0:2 * pad]], axis=1)
        else:
            win = apL[0]

        if apply_in_affine:
            a = a_ref[...]                                      # (Cin_p, 2)
            win = jnp.maximum(win * a[:, 0:1] + a[:, 1:2], 0.0)

        # in-VMEM im2col: K shifted views stacked along the sublane axis
        cols = jnp.concatenate([win[:, k:k + TL] for k in range(K)], axis=0)

        # one MXU matmul per tile (weights pre-reshaped to (Co, K*Ci))
        z = jnp.dot(w_ref[...], cols,
                    preferred_element_type=jnp.float32) + b_ref[...]
        z_ref[0] = z

        # single-pass BN statistics (running sum and sum of squares)
        @pl.when(step == 0)
        def _init():
            s_acc[...] = jnp.zeros_like(s_acc)
            q_acc[...] = jnp.zeros_like(q_acc)

        if mask_tail:
            pos = j * TL + jax.lax.broadcasted_iota(jnp.int32, (1, TL), 1)
            zm = jnp.where(pos < L, z, 0.0)   # exclude length-padding lanes
        else:
            zm = z
        s_acc[...] += jnp.sum(zm, axis=1, keepdims=True)
        q_acc[...] += jnp.sum(zm * z, axis=1, keepdims=True)

        @pl.when(step == pl.num_programs(0) * pl.num_programs(1) - 1)
        def _finalize():
            mean = s_acc[...] * inv_count
            var = jnp.maximum(q_acc[...] * inv_count - mean * mean, 0.0)
            inv = gb_ref[:, 0:1] * jax.lax.rsqrt(var + _BN_EPS)   # EUP rsqrt
            sc_ref[:, 0:1] = inv                                  # scale
            sc_ref[:, 1:2] = gb_ref[:, 1:2] - inv * mean          # shift

    return kernel


def _make_output_kernel(*, pad, TL, use_bottleneck):
    """BN_2 affine + residual shortcut (1x1 conv matmul or identity) + add."""

    def kernel(*refs):
        if use_bottleneck:
            if pad > 0:
                z_ref, sc_ref, xL, xR, wb_ref, bb_ref, o_ref = refs
            else:
                z_ref, sc_ref, xL, wb_ref, bb_ref, o_ref = refs
        else:
            if pad > 0:
                z_ref, sc_ref, xL, xR, o_ref = refs
            else:
                z_ref, sc_ref, xL, o_ref = refs

        y = sc_ref[:, 0:1] * z_ref[0] + sc_ref[:, 1:2]

        # interior of x for this tile (skip the reflection border of the slab)
        if pad > 0:
            xin = jnp.concatenate([xL[0][:, pad:TL], xR[0][:, 0:pad]], axis=1)
        else:
            xin = xL[0]

        if use_bottleneck:
            shortcut = jnp.dot(wb_ref[...], xin,
                               preferred_element_type=jnp.float32) + bb_ref[...]
        else:
            shortcut = xin
        o_ref[0] = (y + shortcut).astype(o_ref.dtype)

    return kernel


# ---------------------------------------------------------------------------
# wrapper
# ---------------------------------------------------------------------------
def res1d_forward(x, params):
    """x: (N, Cin, L) float32; params dict of PyTorch-shaped weights."""
    x = x.astype(jnp.float32)
    N, Cin, L = x.shape
    Cout, _, K = params["w2"].shape
    pad = K // 2
    use_bottleneck = params.get("wb") is not None
    assert K % 2 == 1, "convsize must be odd (ReflectionPad1d(K//2) + residual add)"
    assert pad < L, "ReflectionPad1d requires pad < L"

    f32 = jnp.float32
    Cin_p = _round_up(Cin, _SUBLANE)
    Cout_p = _round_up(Cout, _SUBLANE)

    # lane tile along the length axis (lane-dense; halo must fit in one tile)
    TL = min(_round_up(L, _LANE), 2048)
    if pad > 0:
        TL = max(TL, _round_up(2 * pad, _LANE))
    NTL = -(-L // TL)
    L_pad = NTL * TL
    W = (NTL + 1) * TL           # padded slabs carry one extra halo tile
    inv_count = 1.0 / float(N * L)
    mask_tail = (L_pad != L)

    # ---- layout prep in plain XLA (only cheap ~1x-traffic pads) ------------
    def pad_slab(a):
        n_, c_, l_ = a.shape
        return jnp.pad(a, ((0, 0), (0, Cin_p - c_), (0, W - l_)))

    xr = jnp.pad(x, ((0, 0), (0, 0), (pad, pad)), mode="reflect") if pad > 0 else x
    ap1 = pad_slab(xr)                                            # (N, Cin_p, W)

    def pad_conv_w(w, co_p, ci_p):
        co, ci, k = w.shape
        wp = jnp.pad(w.astype(f32), ((0, co_p - co), (0, ci_p - ci), (0, 0)))
        # row order of the im2col built in-kernel is k*Ci_p + c
        return jnp.transpose(wp, (0, 2, 1)).reshape(co_p, k * ci_p)

    def pad_col(v, c_p):
        return jnp.pad(v.astype(f32), (0, c_p - v.shape[0])).reshape(-1, 1)

    def pad_gb(g, b, c_p):
        gp = jnp.pad(g.astype(f32), (0, c_p - g.shape[0]), constant_values=1.0)
        bp = jnp.pad(b.astype(f32), (0, c_p - b.shape[0]))
        return jnp.stack([gp, bp], axis=1)                        # (Cp, 2)

    w1m = pad_conv_w(params["w1"], Cin_p, Cin_p)
    w2m = pad_conv_w(params["w2"], Cout_p, Cin_p)
    b1c = pad_col(params["b1"], Cin_p)
    b2c = pad_col(params["b2"], Cout_p)
    gb1 = pad_gb(params["g1"], params["be1"], Cin_p)
    gb2 = pad_gb(params["g2"], params["be2"], Cout_p)

    cp_acc = pltpu.CompilerParams(dimension_semantics=("arbitrary", "arbitrary"),
                                  vmem_limit_bytes=_VMEM_LIMIT)
    cp_par = pltpu.CompilerParams(dimension_semantics=("parallel", "parallel"),
                                  vmem_limit_bytes=_VMEM_LIMIT)

    halo_l_spec = pl.BlockSpec((1, Cin_p, TL), lambda n, j: (n, 0, j))
    halo_r_spec = pl.BlockSpec((1, Cin_p, TL), lambda n, j: (n, 0, j + 1))
    grid = (N, NTL)

    # ---- conv + BN-stat kernels (kernel 1 and kernel 2 share this) ---------
    def conv_bn_call(ap, w, b, gb, c_out_p, affine=None):
        in_specs = [halo_l_spec] + ([halo_r_spec] if pad > 0 else [])
        args = [ap] + ([ap] if pad > 0 else [])
        if affine is not None:
            in_specs.append(pl.BlockSpec((Cin_p, 2), lambda n, j: (0, 0)))
            args.append(affine)
        in_specs += [pl.BlockSpec(w.shape, lambda n, j: (0, 0)),
                     pl.BlockSpec((c_out_p, 1), lambda n, j: (0, 0)),
                     pl.BlockSpec((c_out_p, 2), lambda n, j: (0, 0))]
        args += [w, b, gb]

        kernel = _make_conv_bn_kernel(
            K=K, TL=TL, pad=pad, L=L, n_tiles=NTL, inv_count=inv_count,
            apply_in_affine=affine is not None, mask_tail=mask_tail)

        return pl.pallas_call(
            kernel,
            out_shape=(jax.ShapeDtypeStruct((N, c_out_p, L_pad), f32),
                       jax.ShapeDtypeStruct((c_out_p, 2), f32)),
            grid_spec=pltpu.PrefetchScalarGridSpec(
                num_scalar_prefetch=0, grid=grid,
                in_specs=in_specs,
                out_specs=[pl.BlockSpec((1, c_out_p, TL), lambda n, j: (n, 0, j)),
                           pl.BlockSpec((c_out_p, 2), lambda n, j: (0, 0))],
                scratch_shapes=[pltpu.VMEM((c_out_p, 1), f32),
                                pltpu.VMEM((c_out_p, 1), f32)]),
            compiler_params=cp_acc,
        )(*args)

    # ---- kernel 1: conv_1 + BN_1 batch statistics ---------------------------
    z1, sc1 = conv_bn_call(ap1, w1m, b1c, gb1, Cin_p)

    # reflect/zero pad the raw conv_1 output (BN_1 affine + relu commute with
    # reflection padding, so they are applied inside kernel 2 on the halo)
    z1v = z1[:, :, :L] if mask_tail else z1
    z1r = jnp.pad(z1v, ((0, 0), (0, 0), (pad, pad)), mode="reflect") if pad > 0 else z1v
    ap2 = pad_slab(z1r)                                           # (N, Cin_p, W)

    # ---- kernel 2: fused BN_1 affine + relu, conv_2, BN_2 statistics --------
    z2, sc2 = conv_bn_call(ap2, w2m, b2c, gb2, Cout_p, affine=sc1)

    # ---- kernel 3: BN_2 affine + residual (1x1 bottleneck or identity) ------
    in_specs = [pl.BlockSpec((1, Cout_p, TL), lambda n, j: (n, 0, j)),
                pl.BlockSpec((Cout_p, 2), lambda n, j: (0, 0)),
                halo_l_spec] + ([halo_r_spec] if pad > 0 else [])
    args = [z2, sc2, ap1] + ([ap1] if pad > 0 else [])
    if use_bottleneck:
        wb = jnp.pad(params["wb"][:, :, 0].astype(f32),
                     ((0, Cout_p - Cout), (0, Cin_p - Cin)))
        bb = pad_col(params["bb"], Cout_p)
        in_specs += [pl.BlockSpec((Cout_p, Cin_p), lambda n, j: (0, 0)),
                     pl.BlockSpec((Cout_p, 1), lambda n, j: (0, 0))]
        args += [wb, bb]

    out_p = pl.pallas_call(
        _make_output_kernel(pad=pad, TL=TL, use_bottleneck=use_bottleneck),
        out_shape=jax.ShapeDtypeStruct((N, Cout_p, L_pad), f32),
        grid_spec=pltpu.PrefetchScalarGridSpec(
            num_scalar_prefetch=0, grid=grid,
            in_specs=in_specs,
            out_specs=pl.BlockSpec((1, Cout_p, TL), lambda n, j: (n, 0, j))),
        compiler_params=cp_par,
    )(*args)

    return out_p[:, :Cout, :L]


# ---------------------------------------------------------------------------
# pure-JAX reference (mirrors the PyTorch forward, training-mode BN)
# ---------------------------------------------------------------------------
def res1d_reference(x, params):
    K = params["w1"].shape[2]
    pad = K // 2

    def rpad(a):
        return jnp.pad(a, ((0, 0), (0, 0), (pad, pad)), mode="reflect")

    def conv(a, w, b):
        out = jax.lax.conv_general_dilated(
            a, w, window_strides=(1,), padding="VALID",
            dimension_numbers=("NCH", "OIH", "NCH"))
        return out + b[None, :, None]

    def bn(a, g, be):
        mean = a.mean(axis=(0, 2), keepdims=True)
        var = ((a - mean) ** 2).mean(axis=(0, 2), keepdims=True)
        return g[None, :, None] * (a - mean) / jnp.sqrt(var + _BN_EPS) + be[None, :, None]

    y = conv(rpad(x), params["w1"], params["b1"])
    y = jax.nn.relu(bn(y, params["g1"], params["be1"]))
    y = conv(rpad(y), params["w2"], params["b2"])
    y = bn(y, params["g2"], params["be2"])
    if params.get("wb") is not None:
        sc = jnp.einsum("oi,nil->nol", params["wb"][:, :, 0], x) + params["bb"][None, :, None]
    else:
        sc = x
    return y + sc


if __name__ == "__main__":
    # Shapes consistent with the module: batch=2, in_ch=4, out_ch=8, L=16, K=3.
    N, Cin, Cout, L, K = 2, 4, 8, 16, 3

    key = jax.random.PRNGKey(0)
    ks = jax.random.split(key, 12)
    params = {
        "w1": 0.2 * jax.random.normal(ks[0], (Cin, Cin, K), jnp.float32),
        "b1": 0.1 * jax.random.normal(ks[1], (Cin,), jnp.float32),
        "g1": 1.0 + 0.1 * jax.random.normal(ks[2], (Cin,), jnp.float32),
        "be1": 0.1 * jax.random.normal(ks[3], (Cin,), jnp.float32),
        "w2": 0.2 * jax.random.normal(ks[4], (Cout, Cin, K), jnp.float32),
        "b2": 0.1 * jax.random.normal(ks[5], (Cout,), jnp.float32),
        "g2": 1.0 + 0.1 * jax.random.normal(ks[6], (Cout,), jnp.float32),
        "be2": 0.1 * jax.random.normal(ks[7], (Cout,), jnp.float32),
        # bottleneck 1x1 conv (exists because Cin != Cout)
        "wb": 0.2 * jax.random.normal(ks[8], (Cout, Cin, 1), jnp.float32),
        "bb": 0.1 * jax.random.normal(ks[9], (Cout,), jnp.float32),
    }
    x = jax.random.normal(ks[10], (N, Cin, L), jnp.float32)

    out = jax.block_until_ready(res1d_forward(x, params))
    ref = jax.block_until_ready(res1d_reference(x, params))

    assert out.shape == (N, Cout, L)
    import numpy as np
    np.testing.assert_allclose(np.asarray(out), np.asarray(ref), rtol=2e-4, atol=2e-4)

    print("KERNEL_OK")
</pallas_src>

<mosaic_0001>
module attributes {stable_mosaic.version = 11 : i64} {
  func.func @kernel(%arg0: i32, %arg1: i32, %arg2: memref<1x8x128xf32, #tpu.memory_space<vmem>>, %arg3: memref<1x8x128xf32, #tpu.memory_space<vmem>>, %arg4: memref<8x24xf32, #tpu.memory_space<vmem>>, %arg5: memref<8x1xf32, #tpu.memory_space<vmem>>, %arg6: memref<8x2xf32, #tpu.memory_space<vmem>>, %arg7: memref<1x8x128xf32, #tpu.memory_space<vmem>>, %arg8: memref<8x2xf32, #tpu.memory_space<vmem>>, %arg9: memref<8x1xf32, #tpu.memory_space<vmem>>, %arg10: memref<8x1xf32, #tpu.memory_space<vmem>>) attributes {dimension_semantics = [#tpu.dimension_semantics<arbitrary>, #tpu.dimension_semantics<arbitrary>], iteration_bounds = array<i64: 2, 1>, scalar_prefetch = 0 : i64, scratch_operands = 2 : i64, tpu.core_type = #tpu.core_type<tc>, window_params = [{transform_indices = @transform_0, window_bounds = array<i64: 1, 8, 128>}, {transform_indices = @transform_1, window_bounds = array<i64: 1, 8, 128>}, {pipeline_mode = #tpu.pipeline_mode<synchronous>, transform_indices = @transform_2, window_bounds = array<i64: 8, 24>}, {pipeline_mode = #tpu.pipeline_mode<synchronous>, transform_indices = @transform_3, window_bounds = array<i64: 8, 1>}, {pipeline_mode = #tpu.pipeline_mode<synchronous>, transform_indices = @transform_4, window_bounds = array<i64: 8, 2>}, {transform_indices = @transform_5, window_bounds = array<i64: 1, 8, 128>}, {pipeline_mode = #tpu.pipeline_mode<synchronous>, transform_indices = @transform_6, window_bounds = array<i64: 8, 2>}]} {
    %c1_i32 = arith.constant 1 : i32
    %0 = arith.muli %arg0, %c1_i32 : i32
    %1 = arith.addi %0, %arg1 : i32
    %c0 = arith.constant 0 : index
    %c0_0 = arith.constant 0 : index
    %c0_1 = arith.constant 0 : index
    %2 = vector.load %arg3[%c0, %c0_0, %c0_1] : memref<1x8x128xf32, #tpu.memory_space<vmem>>, vector<1x8x128xf32>
    %3 = vector.shape_cast %2 : vector<1x8x128xf32> to vector<8x128xf32>
    %c0_2 = arith.constant 0 : index
    %c0_3 = arith.constant 0 : index
    %c0_4 = arith.constant 0 : index
    %4 = vector.load %arg2[%c0_2, %c0_3, %c0_4] : memref<1x8x128xf32, #tpu.memory_space<vmem>>, vector<1x8x128xf32>
    %5 = vector.shape_cast %4 : vector<1x8x128xf32> to vector<8x128xf32>
    %6 = vector.extract_strided_slice %3 {offsets = [0, 0], sizes = [8, 2], strides = [1, 1]} : vector<8x128xf32> to vector<8x2xf32>
    %7 = tpu.concatenate %5, %6 in 1 : vector<8x128xf32>, vector<8x2xf32> -> vector<8x130xf32>
    %8 = vector.extract_strided_slice %7 {offsets = [0, 0], sizes = [8, 128], strides = [1, 1]} : vector<8x130xf32> to vector<8x128xf32>
    %9 = vector.extract_strided_slice %7 {offsets = [0, 1], sizes = [8, 128], strides = [1, 1]} : vector<8x130xf32> to vector<8x128xf32>
    %10 = vector.extract_strided_slice %7 {offsets = [0, 2], sizes = [8, 128], strides = [1, 1]} : vector<8x130xf32> to vector<8x128xf32>
    %11 = tpu.concatenate %8, %9, %10 in 0 : vector<8x128xf32>, vector<8x128xf32>, vector<8x128xf32> -> vector<24x128xf32>
    %c0_5 = arith.constant 0 : index
    %c0_6 = arith.constant 0 : index
    %12 = vector.load %arg4[%c0_5, %c0_6] : memref<8x24xf32, #tpu.memory_space<vmem>>, vector<8x24xf32>
    %cst = arith.constant dense<0.000000e+00> : vector<8x128xf32>
    %13 = tpu.matmul %12, %11, %cst {dimension_numbers = #tpu.dot_dimension_numbers<[1], [0], [0], [1], [0, 0, 1, 1], [], []>} : vector<8x24xf32>, vector<24x128xf32>, vector<8x128xf32> -> vector<8x128xf32>
    %c0_7 = arith.constant 0 : index
    %c0_8 = arith.constant 0 : index
    %14 = vector.load %arg5[%c0_7, %c0_8] : memref<8x1xf32, #tpu.memory_space<vmem>>, vector<8x1xf32>
    %15 = vector.broadcast %14 : vector<8x1xf32> to vector<8x128xf32>
    %16 = arith.addf %13, %15 : vector<8x128xf32>
    %c0_9 = arith.constant 0 : index
    %c0_10 = arith.constant 0 : index
    %c0_11 = arith.constant 0 : index
    %17 = vector.load %arg7[%c0_9, %c0_10, %c0_11] : memref<1x8x128xf32, #tpu.memory_space<vmem>>, vector<1x8x128xf32>
    %18 = vector.shape_cast %17 : vector<1x8x128xf32> to vector<8x128xf32>
    %19 = vector.shape_cast %16 : vector<8x128xf32> to vector<1x8x128xf32>
    tpu.vector_store %arg7[%c0_9, %c0_10, %c0_11], %19 {strides = array<i32>} : memref<1x8x128xf32, #tpu.memory_space<vmem>>, vector<1x8x128xf32>,
    %c0_i32 = arith.constant 0 : i32
    %20 = arith.cmpi eq, %1, %c0_i32 : i32
    %21 = arith.extui %20 : i1 to i32
    %c0_i32_12 = arith.constant 0 : i32
    %22 = arith.cmpi ne, %21, %c0_i32_12 : i32
    scf.if %22 {
      %cst_26 = arith.constant 0.000000e+00 : f32
      %47 = vector.broadcast %cst_26 : f32 to vector<8x1xf32>
      %c0_27 = arith.constant 0 : index
      %c0_28 = arith.constant 0 : index
      %48 = vector.load %arg9[%c0_27, %c0_28] : memref<8x1xf32, #tpu.memory_space<vmem>>, vector<8x1xf32>
      tpu.vector_store %arg9[%c0_27, %c0_28], %47 {strides = array<i32>} : memref<8x1xf32, #tpu.memory_space<vmem>>, vector<8x1xf32>,
      %cst_29 = arith.constant 0.000000e+00 : f32
      %49 = vector.broadcast %cst_29 : f32 to vector<8x1xf32>
      %c0_30 = arith.constant 0 : index
      %c0_31 = arith.constant 0 : index
      %50 = vector.load %arg10[%c0_30, %c0_31] : memref<8x1xf32, #tpu.memory_space<vmem>>, vector<8x1xf32>
      tpu.vector_store %arg10[%c0_30, %c0_31], %49 {strides = array<i32>} : memref<8x1xf32, #tpu.memory_space<vmem>>, vector<8x1xf32>,
    } else {
    }
    %c128_i32 = arith.constant 128 : i32
    %23 = arith.muli %arg1, %c128_i32 : i32
    %24 = tpu.iota {dimensions = array<i32: 1>} : vector<1x128xi32>
    %25 = vector.broadcast %23 : i32 to vector<1x128xi32>
    %26 = arith.addi %25, %24 : vector<1x128xi32>
    %c16_i32 = arith.constant 16 : i32
    %27 = vector.broadcast %c16_i32 : i32 to vector<1x128xi32>
    %28 = arith.cmpi slt, %26, %27 : vector<1x128xi32>
    %cst_13 = arith.constant 0.000000e+00 : f32
    %29 = vector.shape_cast %28 : vector<1x128xi1> to vector<1x128xi1>
    %30 = vector.broadcast %29 : vector<1x128xi1> to vector<8x128xi1>
    %31 = vector.broadcast %cst_13 : f32 to vector<8x128xf32>
    %32 = arith.select %30, %16, %31 : vector<8x128xi1>, vector<8x128xf32>
    %c0_14 = arith.constant 0 : index
    %c0_15 = arith.constant 0 : index
    %33 = vector.load %arg9[%c0_14, %c0_15] : memref<8x1xf32, #tpu.memory_space<vmem>>, vector<8x1xf32>
    %cst_16 = arith.constant dense<0.000000e+00> : vector<8xf32>
    %34 = vector.multi_reduction <add>, %32, %cst_16 [1] : vector<8x128xf32> to vector<8xf32>
    %35 = vector.shape_cast %34 : vector<8xf32> to vector<8x1xf32>
    %36 = arith.addf %33, %35 : vector<8x1xf32>
    %c0_17 = arith.constant 0 : index
    %c0_18 = arith.constant 0 : index
    %37 = vector.load %arg9[%c0_17, %c0_18] : memref<8x1xf32, #tpu.memory_space<vmem>>, vector<8x1xf32>
    tpu.vector_store %arg9[%c0_17, %c0_18], %36 {strides = array<i32>} : memref<8x1xf32, #tpu.memory_space<vmem>>, vector<8x1xf32>,
    %c0_19 = arith.constant 0 : index
    %c0_20 = arith.constant 0 : index
    %38 = vector.load %arg10[%c0_19, %c0_20] : memref<8x1xf32, #tpu.memory_space<vmem>>, vector<8x1xf32>
    %39 = arith.mulf %32, %16 : vector<8x128xf32>
    %cst_21 = arith.constant dense<0.000000e+00> : vector<8xf32>
    %40 = vector.multi_reduction <add>, %39, %cst_21 [1] : vector<8x128xf32> to vector<8xf32>
    %41 = vector.shape_cast %40 : vector<8xf32> to vector<8x1xf32>
    %42 = arith.addf %38, %41 : vector<8x1xf32>
    %c0_22 = arith.constant 0 : index
    %c0_23 = arith.constant 0 : index
    %43 = vector.load %arg10[%c0_22, %c0_23] : memref<8x1xf32, #tpu.memory_space<vmem>>, vector<8x1xf32>
    tpu.vector_store %arg10[%c0_22, %c0_23], %42 {strides = array<i32>} : memref<8x1xf32, #tpu.memory_space<vmem>>, vector<8x1xf32>,
    %c1_i32_24 = arith.constant 1 : i32
    %44 = arith.cmpi eq, %1, %c1_i32_24 : i32
    %45 = arith.extui %44 : i1 to i32
    %c0_i32_25 = arith.constant 0 : i32
    %46 = arith.cmpi ne, %45, %c0_i32_25 : i32
    scf.if %46 {
      %c0_26 = arith.constant 0 : index
      %c0_27 = arith.constant 0 : index
      %47 = vector.load %arg9[%c0_26, %c0_27] : memref<8x1xf32, #tpu.memory_space<vmem>>, vector<8x1xf32>
      %cst_28 = arith.constant 3.125000e-02 : f32
      %48 = vector.broadcast %cst_28 : f32 to vector<8x1xf32>
      %49 = arith.mulf %47, %48 : vector<8x1xf32>
      %c0_29 = arith.constant 0 : index
      %c0_30 = arith.constant 0 : index
      %50 = vector.load %arg10[%c0_29, %c0_30] : memref<8x1xf32, #tpu.memory_space<vmem>>, vector<8x1xf32>
      %cst_31 = arith.constant 3.125000e-02 : f32
      %51 = vector.broadcast %cst_31 : f32 to vector<8x1xf32>
      %52 = arith.mulf %50, %51 : vector<8x1xf32>
      %53 = arith.mulf %49, %49 : vector<8x1xf32>
      %54 = arith.subf %52, %53 : vector<8x1xf32>
      %cst_32 = arith.constant 0.000000e+00 : f32
      %55 = vector.broadcast %cst_32 : f32 to vector<8x1xf32>
      %56 = arith.maximumf %54, %55 : vector<8x1xf32>
      %c0_33 = arith.constant 0 : index
      %c0_34 = arith.constant 0 : index
      %57 = vector.load %arg6[%c0_33, %c0_34] : memref<8x2xf32, #tpu.memory_space<vmem>>, vector<8x1xf32>
      %cst_35 = arith.constant 9.99999974E-6 : f32
      %58 = vector.broadcast %cst_35 : f32 to vector<8x1xf32>
      %59 = arith.addf %56, %58 : vector<8x1xf32>
      %60 = math.rsqrt %59 : vector<8x1xf32>
      %61 = arith.mulf %57, %60 : vector<8x1xf32>
      %c0_36 = arith.constant 0 : index
      %c0_37 = arith.constant 0 : index
      %62 = vector.load %arg8[%c0_36, %c0_37] : memref<8x2xf32, #tpu.memory_space<vmem>>, vector<8x1xf32>
      tpu.vector_store %arg8[%c0_36, %c0_37], %61 {strides = array<i32>} : memref<8x2xf32, #tpu.memory_space<vmem>>, vector<8x1xf32>,
      %c0_38 = arith.constant 0 : index
      %c1 = arith.constant 1 : index
      %63 = vector.load %arg6[%c0_38, %c1] : memref<8x2xf32, #tpu.memory_space<vmem>>, vector<8x1xf32>
      %64 = arith.mulf %61, %49 : vector<8x1xf32>
      %65 = arith.subf %63, %64 : vector<8x1xf32>
      %c0_39 = arith.constant 0 : index
      %c1_40 = arith.constant 1 : index
      %66 = vector.load %arg8[%c0_39, %c1_40] : memref<8x2xf32, #tpu.memory_space<vmem>>, vector<8x1xf32>
      tpu.vector_store %arg8[%c0_39, %c1_40], %65 {strides = array<i32>} : memref<8x2xf32, #tpu.memory_space<vmem>>, vector<8x1xf32>,
    } else {
    }
    return
  }
  func.func @transform_0(%arg0: i32, %arg1: i32) -> (i32, i32, i32) {
    %c0_i32 = arith.constant 0 : i32
    %c0_i32_0 = arith.constant 0 : i32
    return %arg0, %c0_i32, %arg1 : i32, i32, i32
  }
  func.func @transform_1(%arg0: i32, %arg1: i32) -> (i32, i32, i32) {
    %c1_i32 = arith.constant 1 : i32
    %0 = arith.addi %arg1, %c1_i32 : i32
    %c0_i32 = arith.constant 0 : i32
    %c0_i32_0 = arith.constant 0 : i32
    return %arg0, %c0_i32, %0 : i32, i32, i32
  }
  func.func @transform_2(%arg0: i32, %arg1: i32) -> (i32, i32) {
    %c0_i32 = arith.constant 0 : i32
    %c0_i32_0 = arith.constant 0 : i32
    %c0_i32_1 = arith.constant 0 : i32
    return %c0_i32, %c0_i32_0 : i32, i32
  }
  func.func @transform_3(%arg0: i32, %arg1: i32) -> (i32, i32) {
    %c0_i32 = arith.constant 0 : i32
    %c0_i32_0 = arith.constant 0 : i32
    %c0_i32_1 = arith.constant 0 : i32
    return %c0_i32, %c0_i32_0 : i32, i32
  }
  func.func @transform_4(%arg0: i32, %arg1: i32) -> (i32, i32) {
    %c0_i32 = arith.constant 0 : i32
    %c0_i32_0 = arith.constant 0 : i32
    %c0_i32_1 = arith.constant 0 : i32
    return %c0_i32, %c0_i32_0 : i32, i32
  }
  func.func @transform_5(%arg0: i32, %arg1: i32) -> (i32, i32, i32) {
    %c0_i32 = arith.constant 0 : i32
    %c0_i32_0 = arith.constant 0 : i32
    return %arg0, %c0_i32, %arg1 : i32, i32, i32
  }
  func.func @transform_6(%arg0: i32, %arg1: i32) -> (i32, i32) {
    %c0_i32 = arith.constant 0 : i32
    %c0_i32_0 = arith.constant 0 : i32
    %c0_i32_1 = arith.constant 0 : i32
    return %c0_i32, %c0_i32_0 : i32, i32
  }
}

</mosaic_0001>

<bundles_post_ra>
// kernel: tpu_custom_call.1
= control target key start
LH: loop header
LB: loop body
LE: loop exit
PB: predicated region body
PF: predicated region fallthrough
CT: control target
= control target key end

     0   :  { %s1170_s0 = inlined_call_operand.hbm [shape: f32[2,8,256], index: 0, kind: input, shape index: {}]   ;;  %s1171_s1 = inlined_call_operand.hbm [shape: f32[2,8,256], index: 1, kind: input, shape index: {}]   ;;  %s1172_s2 = inlined_call_operand.vmem [shape: f32[8,24], index: 2, kind: input, shape index: {}]   ;;  %s1173_s3 = inlined_call_operand.vmem [shape: f32[8,1], index: 3, kind: input, shape index: {}]   ;;  %s1174_s4 = inlined_call_operand.vmem [shape: f32[8,2], index: 4, kind: input, shape index: {}]   ;;  %s1175_s5 = inlined_call_operand.hbm [shape: f32[2,8,128], index: 5, kind: output, shape index: {0}]   ;;  %s1176_s6 = inlined_call_operand.vmem [shape: f32[8,2], index: 6, kind: output, shape index: {1}]  }
   0x1   :  { %1181 = sst [smem:[#allocation14_spill]] %s1170_s0 }
   0x2   :  { %12 = vsyncpa [#allocation5], 0 }
   0x3   :  { %14 = vsyncpa [#allocation5 + $0x1], 0 }
   0x4   :  { %15 = vsyncpa [#allocation8], 0 }
   0x5   :  { %17 = vsyncpa [#allocation8 + $0x1], 0 }
   0x6   :  { %18 = vsyncpa [#allocation6], 0 }
   0x7   :  { %20 = vsyncpa [#allocation6 + $0x1], 0  ;;  %s928_s21 = smov 0   ;;  %s930_s22 = smov 0  }
   0x8   :  { %s932_s23 = smov 0   ;;  %s934_s24 = smov 0  }
   0x9   :  { %s936_s25 = smov 0   ;;  %s938_s26 = smov 0  }
   0xa LB: > { %s610_s27 = sadd.s32 4294967295, %s880_s26   ;;  %s611_s28 = sadd.s32 4294967294, %s880_s26   ;;  %s880_s26 = sphi %s938_s26, %s26_s26   ;;  %s876_s25 = sphi %s936_s25, %s1203_s25   ;;  %s872_s24 = sphi %s934_s24, %s1202_s24   ;;  %s868_s23 = sphi %s932_s23, %s1201_s23   ;;  %s864_s22 = sphi %s930_s22, %s1200_s22   ;;  %s860_s21 = sphi %s928_s21, %s1199_s21  }
   0xb   : > { %s38_s29 = sadd.s32 1, %s876_s25  ;;  %s47_s30 = sadd.s32 1, %s868_s23 }
   0xc   : > { %p40_p0 = scmp.ge.s32.totalorder %s38_s29, 2  ;;  %p54_p1 = scmp.ne.s32.totalorder %s868_s23, %s864_s22 }
   0xd   : > { %p55_p2 = scmp.eq.s32.totalorder %s880_s26, 0  ;;  %p60_p3 = scmp.ne.s32.totalorder %s864_s22, %s860_s21 }
   0xe   : > { %s1205_s29 = smov (%p40_p0, %s38_s29), 0  ;;  %p61_p5 = scmp.eq.s32.totalorder %s610_s27, 0 }
   0xf   : > { %1182 = sst [smem:[#allocation13_spill]] %s1205_s29  ;;  %p969_p4 = por %p55_p2, %p54_p1 }
  0x10   : > { %s42_s8 = ssub.s32 %s876_s25, %s1205_s29  ;;  %p179_p6 = scmp.eq.s32.totalorder %s610_s27, 1 }
  0x11   : > { %p45_p7 = scmp.eq.s32.totalorder %s42_s8, 0  ;;  %p975_p8 = por %p61_p5, %p60_p3 }
  0x12   : > { %p979_p9 = por %p179_p6, %p54_p1  ;;  %p185_p10 = scmp.eq.s32.totalorder %s611_s28, 1 }
  0x13   : > { %s1184_s9 = scalar_select %p975_p8, 1, 0 }
  0x14   : > { %s1185_s10 = scalar_select %p979_p9, 1, 0 }
  0x15   : > { %s984_s11 = scalar_select %p45_p7, %s868_s23, %s47_s30  }
  0x16   : > { %p986_p11 = por %p185_p10, %p60_p3  ;;  %p666_p13 = scmp.lt.s32.totalorder %s880_s26, 2 }
  0x17   : > { %s993_s13 = sand.u32 1, %s868_s23   ;;  %s631_s15 = sshll.u32 %s876_s25, 8 }
  0x18   : > { %s1186_s12 = scalar_select %p986_p11, 1, 0 }
  0x19   : > { %s1177_s14 = sshll.u32 %s993_s13, 3  ;;  %s1187_s0 = sld [smem:[#allocation14_spill]] }
  0x1a   : > { %s239_s19 = scalar_lea.vmem [#allocation4], %s1177_s14  ;;  %p1010_p0 = pnand %p666_p13, %p969_p4 }
  0x1b   : > { %s248_s20 = sshll.u32 %s239_s19, 4  ;;  %s236_s28 = scalar_lea.sflag [#allocation5], %s993_s13  ;;  %s1006_s20 = int_to_ptr.vmem [resolvable:$true] %s248_s20 }
  0x1c   : > { %p735_p5 = pneg %p1010_p0 }
  0x1f   : > { %s1002_s18 = scalar_lea.hbm %s1187_s0, %s631_s15  ;;  %s738_s7 = scalar_lea.hbm %s1187_s0, 512 }
  0x20   : > { %s733_s30 = scalar_lea.hbm %s1002_s18, 128  ;;  %p739_p4 = scmp.lt.u32.totalorder %s1002_s18, %s1187_s0 }
  0x21   : > { %p734_p3 = scmp.ne.s32.totalorder %s1002_s18, %s733_s30  ;;  %p740_p10 = scmp.lt.u32.totalorder %s738_s7, %s733_s30 }
  0x22   : > { %p742_p12 = scmp.lt.u32.totalorder %s733_s30, %s1002_s18 }
  0x23   : > { %p736_p6 = pnand %p735_p5, %p734_p3  ;;  %p741_p13 = por %p740_p10, %p739_p4 }
  0x25   : > { %p737_p7 = pneg %p736_p6  ;;  %p743_p1 = por %p742_p12, %p741_p13 }
  0x27   : > { %p744_p2 = pnand %p743_p1, %p737_p7 }
  0x29   : > { %747 = shalt.err (!%p744_p2)
}
  0x2a   : > { %s748_s14 = scalar_lea.vmem %s1006_s20, 128  ;;  %s882_s8 = smov [#allocation4]  }
  0x2b   : > { %p749_p3 = scmp.ne.s32.totalorder %s1006_s20, %s748_s14  ;;  %s753_s16 = sshll.u32 %s882_s8, 4  ;;  %s754_s16 = int_to_ptr.vmem [resolvable:$false] %s753_s16 }
  0x2c   : > { %s755_s17 = scalar_lea.vmem %s754_s16, 256  ;;  %p756_p9 = scmp.lt.s32.totalorder %s1006_s20, %s754_s16 }
  0x2d   : > { %p751_p6 = pnand %p749_p3, %p735_p5  ;;  %p757_p4 = scmp.lt.s32.totalorder %s755_s17, %s748_s14 }
  0x2f   : > { %p752_p11 = pneg %p751_p6  ;;  %p758_p10 = por %p757_p4, %p756_p9 }
  0x31   : > { %p759_p12 = pnand %p758_p10, %p752_p11 }
  0x33   : > { %762 = shalt.err (!%p759_p12)
}
  0x34   : > { %658 = dma.hbm_to_vmem [thread:$0]  (!%p1010_p0), %s1002_s18, 128, %s1006_s20, %s236_s28  }
  0x35   : > { %p1189_p1 = scmp.lt.s32.totalorder %s880_s26, 3  ;;  %p1190_p2 = scmp.ge.s32.totalorder %s880_s26, 1 }
  0x36   : > { %s543_s19 = scalar_lea.hbm %s1171_s1, %s631_s15  ;;  %s1192_s8 = sshll.u32 %s993_s13, 3 }
  0x37   : > { %p1046_p7 = pnand %p1190_p2, %p1189_p1  ;;  %s259_s16 = scalar_lea.vmem [#allocation7], %s1192_s8 }
  0x38   : > { %s269_s17 = sshll.u32 %s259_s16, 4  ;;  %s1057_s0 = scalar_lea.hbm %s543_s19, 128  ;;  %s270_s17 = int_to_ptr.vmem [resolvable:$true] %s269_s17 }
  0x39   : > { %s1191_s30 = scalar_select %p1046_p7, 1, 0 }
  0x3a   : > { %s256_s18 = scalar_lea.sflag [#allocation8], %s993_s13  ;;  %s793_s20 = scalar_lea.hbm %s543_s19, 256 }
  0x3b   : > { %p764_p9 = scmp.ne.s32.totalorder %s1057_s0, %s793_s20  ;;  %s768_s15 = scalar_lea.hbm %s1171_s1, 512 }
  0x3c   : > { %p769_p3 = scmp.lt.u32.totalorder %s1057_s0, %s1171_s1  ;;  %p770_p6 = scmp.lt.u32.totalorder %s768_s15, %s793_s20 }
  0x3d   : > { %p766_p11 = pnand %p764_p9, %p735_p5  ;;  %p772_p10 = scmp.lt.u32.totalorder %s793_s20, %s1057_s0 }
  0x3e   : > { %p771_p4 = por %p770_p6, %p769_p3 }
  0x3f   : > { %p767_p13 = pneg %p766_p11 }
  0x40   : > { %p773_p12 = por %p772_p10, %p771_p4 }
  0x42   : > { %p774_p1 = pnand %p773_p12, %p767_p13 }
  0x44   : > { %777 = shalt.err (!%p774_p1)
}
  0x45   : > { %s778_s13 = scalar_lea.vmem %s270_s17, 128  ;;  %s883_s19 = smov [#allocation7]  }
  0x46   : > { %p779_p2 = scmp.ne.s32.totalorder %s270_s17, %s778_s13  ;;  %s783_s29 = sshll.u32 %s883_s19, 4  ;;  %s784_s29 = int_to_ptr.vmem [resolvable:$false] %s783_s29 }
  0x47   : > { %s785_s8 = scalar_lea.vmem %s784_s29, 256  ;;  %p786_p8 = scmp.lt.s32.totalorder %s270_s17, %s784_s29 }
  0x48   : > { %p781_p9 = pnand %p779_p2, %p735_p5  ;;  %p787_p7 = scmp.lt.s32.totalorder %s785_s8, %s778_s13 }
  0x4a   : > { %p782_p11 = pneg %p781_p9  ;;  %p788_p3 = por %p787_p7, %p786_p8 }
  0x4c   : > { %p789_p6 = pnand %p788_p3, %p782_p11 }
  0x4e   : > { %792 = shalt.err (!%p789_p6)
}
  0x4f   : > { %661 = dma.hbm_to_vmem [thread:$0]  (!%p1010_p0), %s1057_s0, 128, %s270_s17, %s256_s18  }
  0x50   : > { %p1193_p13 = scmp.ne.s32.totalorder %s1191_s30, 0 }
  0x51   : > { %s1081_s16 = sand.u32 (!%p1193_p13), 1, %s864_s22   ;;  %p1194_p8 = scmp.ne.s32.totalorder (!%p1193_p13), %s1184_s9, 0 }
  0x52   : > { %278 = sbr.rel (%p1193_p13) target bundleno = 763 (0x2fb), region = 40  ;;  %s1084_s20 = sshll.u32 (!%p1193_p13), %s1081_s16, 3 }
  0x53   : > { %s281_s28 = scalar_lea.sflag (!%p1193_p13), [#allocation5], %s1081_s16  ;;  %s284_s15 = scalar_lea.vmem (!%p1193_p13), [#allocation4], %s1084_s20 }
  0x59   : > { %847 = dma.done.wait (%p1194_p8), %s281_s28, 128  }
  0x5a   : > { %849 = vsyncadd (%p1194_p8), %s281_s28, 4294967168  ;;  %s290_s0 = scalar_lea.sflag [#allocation8], %s1081_s16  ;;  %s293_s27 = scalar_lea.vmem [#allocation7], %s1084_s20 }
  0x5b   : > { %851 = dma.done.wait (%p1194_p8), %s290_s0, 128  }
  0x5c   : > { %853 = vsyncadd (%p1194_p8), %s290_s0, 4294967168  ;;  %v884_v0 = vmov 0.0|0.0   ;;  %vm885_vm0 = vmmov 0   ;;  %v886_v1 = vmov 0.0   ;;  %v329_v2 = vld [vmem:[%s293_s27] sm:$0xff]  ;;  %v330_v3 = vld [vmem:[%s284_s15] sm:$0xff] }
  0x5d   : > { %646 = vmatprep.subr.bf16.mxu0 %v884_v0  ;;  %643 = vmatprep.mubr.msk.f32.mxu0 %vm885_vm0, %v886_v1  ;;  %v724_v4 = vpack.i.bf16 %v329_v2, %v330_v3  ;;  %s887_s30 = smov 126   ;;  %v888_v5 = vmov 0   ;;  %v348_v6 = vld [vmem:[%s1173_s3] sm:$0xff]  ;;  %s889_s14 = smov 127   ;;  %vm337_vm1 = vcmask 1039360   ;;  %vm344_vm2 = vcmask 1031168  }
  0x5e   : > { %342 = vrot.lane.b32.xlu1 %v329_v2, %s887_s30  ;;  %730 = vset.pattern.permute.xlu0 %v888_v5  ;;  %v347_v15 = vld [vmem:[%s1172_s2] sm:$0xff]  ;;  %vm354_vm3 = vcmask 195584   ;;  %s324_s13 = scalar_lea.vmem [#allocation9], %s1084_s20  ;;  %p625_p0 = scmp.ne.s32.totalorder %s872_s24, 0 }
  0x5f   : > { %729 = vset.pattern.permute.xlu1 %v888_v5  ;;  %725 = vrot.lane.b32.xlu0 %v724_v4, %s889_s14  ;;  %vm433_vm4 = vcmask (!%p625_p0), 7168   ;;  %v890_v20 = vmov (!%p625_p0), 0.0  }
  0x60   : > { %434 = vst.msk [vmem:[#allocation2] sm:$0xff] (!%p625_p0), %vm433_vm4, %v890_v20  ;;  %435 = vst.msk [vmem:[#allocation3] sm:$0xff] (!%p625_p0), %vm433_vm4, %v890_v20 }
  0x62   : > { %351 = vperm.xlu1 %729, %v348_v6  }
  0x63   : > { %340 = vrot.lane.b32.xlu0 %v330_v3, %s887_s30 }
  0xd0   : > { %v343_v12 = vpop.permute.xlu1 %342 }
  0xd1   : > { %v726_v7 = vpop.permute.xlu0 %725 }
  0xd2   : > { %v728_v8 = vunpack.i.h.bf16 %v726_v7  ;;  %v727_v9 = vunpack.i.l.bf16 %v726_v7 }
  0xd4   : > { %v338_v10 = vsel %vm337_vm1, %v727_v9, %v728_v8 }
  0xd5   : > { %v647_v11 = vpack.c.bf16 %v338_v10, %v330_v3  ;;  %v341_v13 = vpop.permute.xlu0 %340 }
  0xd6   : > { %v345_v14 = vsel %vm344_vm2, %v341_v13, %v343_v12 }
  0xd7   : > { %648 = vmatpush3.bf16.msra.mxu0 %v647_v11 }
  0xd8   : > { %641 = vmatprep.subr.mxu0 %v886_v1 }
  0xdb   : > { %642 = vmatpush3.msra.mxu0 %v345_v14 }
  0xdc   : > { %644 = vmatmul.mubr.msk.f32.vlgmr.msra.gmra.mrb[0].mxu0 %vm354_vm3, %v347_v15 }
  0xe1   : > { %v352_v16 = vpop.permute.xlu1 %351 }
 0x1ac   : > { %432 = sbr.rel (%p625_p0) target bundleno = 435 (0x1b3), region = 52 }
 0x1af   : > { %v424_v17 = vpop.f32.mrb[0].mxu0 }
 0x1b0   : > { %v425_v18 = vadd.f32 %v424_v17, %v352_v16  ;;  %v645_v19 = vpop.f32.mrb[1].mxu0 }
 0x1b2   : > { %428 = vst [vmem:[%s324_s13] sm:$0xff] %v425_v18 }
 0x1b3 PF: > { %v437_v21 = vlaneseq  ;;  %v445_v25 = vld [vmem:[#allocation2] sm:$0xff]  ;;  %vm449_vm6 = vcmask 7168   ;;  %v451_v28 = vld [vmem:[#allocation3] sm:$0xff]  ;;  %p626_p5 = scmp.ne.s32.totalorder %s872_s24, 1 }
 0x1b4   : > { %v468_v39 = vld [vmem:[%s1174_s4] sm:$0xff] (!%p626_p5)  ;;  %s891_s15 = smov (!%p626_p5), 1   ;;  %vm480_vm7 = vcmask (!%p626_p5), 15368  }
 0x1b5   : > { %v438_v22 = vand.u32 127, %v437_v21 }
 0x1b7   : > { %vm441_vm5 = vcmp.lt.s32.totalorder %v438_v22, 16 }
 0x1b8   : > { %v444_v23 = vsel %vm441_vm5, %v425_v18, 0.0 }
 0x1b9   : > { %446 = vadd.xlane.f32.xlu0 %v444_v23  ;;  %v452_v24 = vmul.f32 %v444_v23, %v425_v18 }
 0x1bd   : > { %453 = vadd.xlane.f32.xlu0 %v452_v24 }
 0x246   : > { %v447_v26 = vpop.xlane.xlu0 %446 }
 0x247   : > { %v448_v27 = vadd.f32 %v447_v26, %v445_v25  ;;  %460 = sbr.rel (%p626_p5) target bundleno = 738 (0x2e2), region = 56 }
 0x249   : > { %450 = vst.msk [vmem:[#allocation2] sm:$0xff] %vm449_vm6, %v448_v27 }
 0x24a   : > { %v454_v29 = vpop.xlane.xlu0 %453 }
 0x24b   : > { %v455_v30 = vadd.f32 %v454_v29, %v451_v28 }
 0x24d   : > { %456 = vst.msk [vmem:[#allocation3] sm:$0xff] %vm449_vm6, %v455_v30 }
 0x250   : > { %v461_v31 = vld [vmem:[#allocation2] sm:$0xff] }
 0x251   : > { %v462_v33 = vmul.f32 0.03125, %v461_v31 }
 0x253   : > { %v465_v35 = vmul.f32 %v462_v33, %v462_v33 }
 0x254   : > { %v463_v32 = vld [vmem:[#allocation3] sm:$0xff] }
 0x255   : > { %v464_v34 = vmul.f32 0.03125, %v463_v32 }
 0x257   : > { %v466_v36 = vsub.f32 %v464_v34, %v465_v35 }
 0x259   : > { %v467_v37 = vmax.f32 %v466_v36, 0.0 }
 0x25b   : > { %v469_v38 = vadd.f32 1e-05, %v467_v37 }
 0x25d   : > { %731 = vrsqrt.f32 %v469_v38 }
 0x267   : > { %v732_v40 = vpop.eup %731 }
 0x268   : > { %v471_v41 = vmul.f32 %v732_v40, %v468_v39 }
 0x26a   : > { %472 = vst.msk [vmem:[%s1176_s6] sm:$0xff] %vm449_vm6, %v471_v41  ;;  %v474_v42 = vmul.f32 %v471_v41, %v462_v33 }
 0x26c   : > { %476 = vrot.lane.b32.xlu0 %v474_v42, %s891_s15 }
 0x2de   : > { %v477_v43 = vpop.permute.xlu0 %476 }
 0x2df   : > { %v479_v44 = vsub.f32 %v468_v39, %v477_v43 }
 0x2e1   : > { %481 = vst.msk [vmem:[%s1176_s6] sm:$0xff] %vm480_vm7, %v479_v44 }
 0x2e2 PF: > { %s628_s30 = sshll.u32 %s872_s24, 7  ;;  %s497_s9 = sshll.u32 %s324_s13, 4  ;;  %s498_s9 = int_to_ptr.vmem [resolvable:$true] %s497_s9 }
 0x2e3   : > { %s1125_s14 = scalar_lea.hbm %s1175_s5, %s628_s30  ;;  %s483_s7 = scalar_lea.sflag [#allocation6], %s1081_s16 }
 0x2e4   : > { %s794_s19 = scalar_lea.vmem %s498_s9, 128  ;;  %p1195_p4 = scmp.ne.s32.totalorder %s1185_s10, 0 }
 0x2e5   : > { %p795_p7 = scmp.ne.s32.totalorder %s498_s9, %s794_s19  ;;  %s892_s29 = smov [#allocation9]  }
 0x2e6   : > { %s798_s8 = sshll.u32 %s892_s29, 4  ;;  %s799_s8 = int_to_ptr.vmem [resolvable:$false] %s798_s8 }
 0x2e7   : > { %p796_p10 = pnand %p795_p7, %p1195_p4  ;;  %s800_s28 = scalar_lea.vmem %s799_s8, 256 }
 0x2e8   : > { %p801_p1 = scmp.lt.s32.totalorder %s498_s9, %s799_s8  ;;  %p802_p2 = scmp.lt.s32.totalorder %s800_s28, %s794_s19 }
 0x2e9   : > { %p797_p12 = pneg %p796_p10 }
 0x2ea   : > { %p803_p9 = por %p802_p2, %p801_p1 }
 0x2ec   : > { %p804_p11 = pnand %p803_p9, %p797_p12 }
 0x2ee   : > { %807 = shalt.err (!%p804_p11)
}
 0x2ef   : > { %s808_s24 = scalar_lea.hbm %s1125_s14, 128  ;;  %s812_s13 = scalar_lea.hbm %s1175_s5, 256 }
 0x2f0   : > { %p809_p3 = scmp.ne.s32.totalorder %s1125_s14, %s808_s24  ;;  %p813_p8 = scmp.lt.u32.totalorder %s1125_s14, %s1175_s5 }
 0x2f1   : > { %p814_p0 = scmp.lt.u32.totalorder %s812_s13, %s808_s24  ;;  %p816_p7 = scmp.lt.u32.totalorder %s808_s24, %s1125_s14 }
 0x2f2   : > { %p810_p6 = pnand %p809_p3, %p1195_p4 }
 0x2f3   : > { %p815_p5 = por %p814_p0, %p813_p8 }
 0x2f4   : > { %p811_p13 = pneg %p810_p6 }
 0x2f5   : > { %p817_p10 = por %p816_p7, %p815_p5 }
 0x2f7   : > { %p818_p12 = pnand %p817_p10, %p811_p13 }
 0x2f9   : > { %821 = shalt.err (!%p818_p12)
}
 0x2fa   : > { %653 = dma.vmem_to_hbm [thread:$0]  (%p1195_p4), %s498_s9, 128, %s1125_s14, %s483_s7  }
 0x2fb PF: > { %s515_s27 = sand.u32 1, %s860_s21   ;;  %p1196_p1 = scmp.ne.s32.totalorder %s1186_s12, 0 }
 0x2fc   : > { %p1197_p2 = scmp.ge.s32.totalorder %s880_s26, 2  ;;  %s516_s30 = scalar_lea.sflag [#allocation6], %s515_s27 }
 0x2fe   : > { %p663_p9 = pnand %p1197_p2, %p1196_p1 }
 0x300   : > { %855 = dma.done.wait (!%p663_p9), %s516_s30, 128  }
 0x301   : > { %857 = vsyncadd (!%p663_p9), %s516_s30, 4294967168  ;;  %s26_s26 = sadd.s32 1, %s880_s26   ;;  %s1198_s10 = sld [smem:[#allocation13_spill]] }
 0x302   : > { %p23_p11 = scmp.ge.s32.totalorder %s26_s26, 4   ;;  %s1199_s21 = smov %s864_s22 }
 0x303   : > { %s1200_s22 = smov %s868_s23  ;;  %s1201_s23 = smov %s984_s11 }
 0x304   : > { %s1202_s24 = smov %s876_s25  ;;  %25 = sbr.rel (!%p23_p11) target bundleno = 10 (0xa), region = 114 }
 0x307   : > { %s1203_s25 = smov %s1198_s10 }
 0x30b   :  { %521 = vsyncpa [#allocation5], 1 }
 0x30c   :  { %523 = vsyncpa [#allocation5 + $0x1], 1 }
 0x30d   :  { %524 = vsyncpa [#allocation8], 1 }
 0x30e   :  { %526 = vsyncpa [#allocation8 + $0x1], 1 }
 0x30f   :  { %527 = vsyncpa [#allocation6], 1 }
 0x310   :  { %529 = vsyncpa [#allocation6 + $0x1], 1 }

</bundles_post_ra>
